<compile_context>
chip_gen: v5e
topology: v5e:2x2
jax: 0.10.0
libtpu: 0.0.40
codegen_flags: <defaults>
</compile_context>

<pallas_src>
import math

import jax
import jax.numpy as jnp
from jax import lax
from jax.experimental import pallas as pl
from jax.experimental.pallas import tpu as pltpu


def _regressor_kernel(x_ref,
                      w1_ref, b1_ref, g1_ref, be1_ref,
                      w2_ref, b2_ref, g2_ref, be2_ref,
                      w3_ref, b3_ref, g3_ref, be3_ref,
                      w4_ref, b4_ref,
                      o_ref, *, eps, negative_slope):
    x = x_ref[...].astype(jnp.float32)

    def linear(h, w_ref, b_ref):
        return (jnp.dot(h, w_ref[...].astype(jnp.float32),
                        preferred_element_type=jnp.float32)
                + b_ref[...].astype(jnp.float32))

    def bn_lrelu(h, g_ref, be_ref):
        # Training-mode BatchNorm1d: batch mean and *biased* batch variance,
        # eps added to the variance (PyTorch semantics).
        mean = jnp.mean(h, axis=0, keepdims=True)
        hc = h - mean
        var = jnp.mean(hc * hc, axis=0, keepdims=True)
        inv_std = lax.rsqrt(var + jnp.float32(eps))   # EUP; avoids per-element divide
        y = (g_ref[...].astype(jnp.float32) * hc * inv_std
             + be_ref[...].astype(jnp.float32))
        # F.leaky_relu, default negative_slope = 0.01
        return jnp.where(y > 0, y, jnp.float32(negative_slope) * y)

    h = bn_lrelu(linear(x, w1_ref, b1_ref), g1_ref, be1_ref)
    h = bn_lrelu(linear(h, w2_ref, b2_ref), g2_ref, be2_ref)
    h = bn_lrelu(linear(h, w3_ref, b3_ref), g3_ref, be3_ref)
    o_ref[...] = linear(h, w4_ref, b4_ref).astype(o_ref.dtype)


def regressor_forward(x, params, *, eps=1e-5, negative_slope=0.01):
    """Pallas implementation of Regressor.forward.

    x: (batch, d_model) float array.
    params: dict with torch-layout weights:
        w1 (latent, d_model), b1 (latent,), g1/be1 (latent,)   [BN gamma/beta]
        w2, b2, g2, be2; w3, b3, g3, be3; w4 (1, latent), b4 (1,)
    """
    B, d_model = x.shape
    latent = params["w1"].shape[0]

    f32 = jnp.float32
    # Pre-transpose Linear weights (torch stores (out, in)) and lift vectors to 2-D.
    w1t = params["w1"].astype(f32).T                      # (d_model, latent)
    w2t = params["w2"].astype(f32).T                      # (latent, latent)
    w3t = params["w3"].astype(f32).T                      # (latent, latent)
    w4t = params["w4"].astype(f32).T                      # (latent, 1)
    b1 = params["b1"].astype(f32).reshape(1, latent)
    b2 = params["b2"].astype(f32).reshape(1, latent)
    b3 = params["b3"].astype(f32).reshape(1, latent)
    b4 = params["b4"].astype(f32).reshape(1, 1)
    g1 = params["g1"].astype(f32).reshape(1, latent)
    g2 = params["g2"].astype(f32).reshape(1, latent)
    g3 = params["g3"].astype(f32).reshape(1, latent)
    be1 = params["be1"].astype(f32).reshape(1, latent)
    be2 = params["be2"].astype(f32).reshape(1, latent)
    be3 = params["be3"].astype(f32).reshape(1, latent)

    args = (x, w1t, b1, g1, be1, w2t, b2, g2, be2, w3t, b3, g3, be3, w4t, b4)

    # Rough single-block VMEM footprint: x + output + ~6 (B, latent) f32
    # intermediates + params. Keep comfortably under the v7x 64 MiB ceiling.
    footprint = 4 * (B * d_model + B + 6 * B * latent
                     + sum(int(a.size) for a in args[1:]))
    if footprint > 40 * 1024 * 1024:
        raise ValueError(
            "Batch too large for the single-block fused kernel "
            f"({footprint} bytes); a batch-tiled multi-pass variant is needed.")

    def full_spec(shape):
        zeros = (0,) * len(shape)
        return pl.BlockSpec(shape, lambda i, _z=zeros: _z)

    in_specs = [full_spec(a.shape) for a in args]
    out_spec = full_spec((B, 1))

    param_elems = sum(int(a.size) for a in args[1:])
    cost = pl.CostEstimate(
        flops=2 * B * (d_model * latent + 2 * latent * latent + latent)
              + 12 * B * latent,
        transcendentals=3 * latent,
        bytes_accessed=4 * (B * d_model + B + param_elems),
    )

    out = pl.pallas_call(
        lambda *refs: _regressor_kernel(*refs, eps=eps,
                                        negative_slope=negative_slope),
        out_shape=jax.ShapeDtypeStruct((B, 1), x.dtype),
        grid=(1,),
        in_specs=in_specs,
        out_specs=out_spec,
        compiler_params=pltpu.CompilerParams(
            dimension_semantics=("arbitrary",),
            vmem_limit_bytes=48 * 1024 * 1024,
        ),
        cost_estimate=cost,
    )(*args)
    return out


if __name__ == "__main__":
    key = jax.random.PRNGKey(0)
    batch, d_model, latent = 64, 64, 32
    ks = jax.random.split(key, 6)

    def lin_init(k, out_f, in_f):
        # Mimic nn.Linear's uniform(-1/sqrt(in), 1/sqrt(in)) init, deterministically.
        bound = 1.0 / math.sqrt(in_f)
        kw, kb = jax.random.split(k)
        w = jax.random.uniform(kw, (out_f, in_f), jnp.float32, -bound, bound)
        b = jax.random.uniform(kb, (out_f,), jnp.float32, -bound, bound)
        return w, b

    w1, b1 = lin_init(ks[0], latent, d_model)
    w2, b2 = lin_init(ks[1], latent, latent)
    w3, b3 = lin_init(ks[2], latent, latent)
    w4, b4 = lin_init(ks[3], 1, latent)
    # BatchNorm1d init: gamma = 1, beta = 0.
    g1 = jnp.ones((latent,), jnp.float32); be1 = jnp.zeros((latent,), jnp.float32)
    g2 = jnp.ones((latent,), jnp.float32); be2 = jnp.zeros((latent,), jnp.float32)
    g3 = jnp.ones((latent,), jnp.float32); be3 = jnp.zeros((latent,), jnp.float32)

    x = jax.random.normal(ks[4], (batch, d_model), jnp.float32)

    params = dict(w1=w1, b1=b1, g1=g1, be1=be1,
                  w2=w2, b2=b2, g2=g2, be2=be2,
                  w3=w3, b3=b3, g3=g3, be3=be3,
                  w4=w4, b4=b4)

    y = regressor_forward(x, params)
    y = jax.block_until_ready(y)
    assert y.shape == (batch, 1)

    # Pure-JAX reference (training-mode BN: batch mean, biased variance, eps=1e-5).
    def ref_forward(x):
        def bn(h, g, b):
            m = h.mean(0, keepdims=True)
            v = ((h - m) ** 2).mean(0, keepdims=True)
            return g * (h - m) / jnp.sqrt(v + 1e-5) + b
        def lrelu(h):
            return jnp.where(h > 0, h, 0.01 * h)
        h = x @ w1.T + b1
        h = lrelu(bn(h, g1, be1))
        h = h @ w2.T + b2
        h = lrelu(bn(h, g2, be2))
        h = h @ w3.T + b3
        h = lrelu(bn(h, g3, be3))
        return h @ w4.T + b4

    ref = ref_forward(x)
    assert jnp.allclose(y, ref, atol=2e-4, rtol=2e-4), "mismatch vs reference"

    print("KERNEL_OK")
</pallas_src>

<mosaic_0001>
module attributes {stable_mosaic.version = 11 : i64} {
  func.func @_lambda_(%arg0: i32, %arg1: memref<64x64xf32, #tpu.memory_space<vmem>>, %arg2: memref<64x32xf32, #tpu.memory_space<vmem>>, %arg3: memref<1x32xf32, #tpu.memory_space<vmem>>, %arg4: memref<1x32xf32, #tpu.memory_space<vmem>>, %arg5: memref<1x32xf32, #tpu.memory_space<vmem>>, %arg6: memref<32x32xf32, #tpu.memory_space<vmem>>, %arg7: memref<1x32xf32, #tpu.memory_space<vmem>>, %arg8: memref<1x32xf32, #tpu.memory_space<vmem>>, %arg9: memref<1x32xf32, #tpu.memory_space<vmem>>, %arg10: memref<32x32xf32, #tpu.memory_space<vmem>>, %arg11: memref<1x32xf32, #tpu.memory_space<vmem>>, %arg12: memref<1x32xf32, #tpu.memory_space<vmem>>, %arg13: memref<1x32xf32, #tpu.memory_space<vmem>>, %arg14: memref<32x1xf32, #tpu.memory_space<vmem>>, %arg15: memref<1x1xf32, #tpu.memory_space<vmem>>, %arg16: memref<64x1xf32, #tpu.memory_space<vmem>>) attributes {dimension_semantics = [#tpu.dimension_semantics<arbitrary>], iteration_bounds = array<i64: 1>, scalar_prefetch = 0 : i64, scratch_operands = 0 : i64, tpu.core_type = #tpu.core_type<tc>, window_params = [{pipeline_mode = #tpu.pipeline_mode<synchronous>, transform_indices = @transform_0, window_bounds = array<i64: 64, 64>}, {pipeline_mode = #tpu.pipeline_mode<synchronous>, transform_indices = @transform_1, window_bounds = array<i64: 64, 32>}, {pipeline_mode = #tpu.pipeline_mode<synchronous>, transform_indices = @transform_2, window_bounds = array<i64: 1, 32>}, {pipeline_mode = #tpu.pipeline_mode<synchronous>, transform_indices = @transform_3, window_bounds = array<i64: 1, 32>}, {pipeline_mode = #tpu.pipeline_mode<synchronous>, transform_indices = @transform_4, window_bounds = array<i64: 1, 32>}, {pipeline_mode = #tpu.pipeline_mode<synchronous>, transform_indices = @transform_5, window_bounds = array<i64: 32, 32>}, {pipeline_mode = #tpu.pipeline_mode<synchronous>, transform_indices = @transform_6, window_bounds = array<i64: 1, 32>}, {pipeline_mode = #tpu.pipeline_mode<synchronous>, transform_indices = @transform_7, window_bounds = array<i64: 1, 32>}, {pipeline_mode = #tpu.pipeline_mode<synchronous>, transform_indices = @transform_8, window_bounds = array<i64: 1, 32>}, {pipeline_mode = #tpu.pipeline_mode<synchronous>, transform_indices = @transform_9, window_bounds = array<i64: 32, 32>}, {pipeline_mode = #tpu.pipeline_mode<synchronous>, transform_indices = @transform_10, window_bounds = array<i64: 1, 32>}, {pipeline_mode = #tpu.pipeline_mode<synchronous>, transform_indices = @transform_11, window_bounds = array<i64: 1, 32>}, {pipeline_mode = #tpu.pipeline_mode<synchronous>, transform_indices = @transform_12, window_bounds = array<i64: 1, 32>}, {pipeline_mode = #tpu.pipeline_mode<synchronous>, transform_indices = @transform_13, window_bounds = array<i64: 32, 1>}, {pipeline_mode = #tpu.pipeline_mode<synchronous>, transform_indices = @transform_14, window_bounds = array<i64: 1, 1>}, {pipeline_mode = #tpu.pipeline_mode<synchronous>, transform_indices = @transform_15, window_bounds = array<i64: 64, 1>}]} {
    %c0 = arith.constant 0 : index
    %c0_0 = arith.constant 0 : index
    %0 = vector.load %arg1[%c0, %c0_0] : memref<64x64xf32, #tpu.memory_space<vmem>>, vector<64x64xf32>
    %c0_1 = arith.constant 0 : index
    %c0_2 = arith.constant 0 : index
    %1 = vector.load %arg2[%c0_1, %c0_2] : memref<64x32xf32, #tpu.memory_space<vmem>>, vector<64x32xf32>
    %cst = arith.constant dense<0.000000e+00> : vector<64x32xf32>
    %2 = tpu.matmul %0, %1, %cst {dimension_numbers = #tpu.dot_dimension_numbers<[1], [0], [0], [1], [0, 0, 1, 1], [], []>} : vector<64x64xf32>, vector<64x32xf32>, vector<64x32xf32> -> vector<64x32xf32>
    %c0_3 = arith.constant 0 : index
    %c0_4 = arith.constant 0 : index
    %3 = vector.load %arg3[%c0_3, %c0_4] : memref<1x32xf32, #tpu.memory_space<vmem>>, vector<1x32xf32>
    %4 = vector.broadcast %3 : vector<1x32xf32> to vector<64x32xf32>
    %5 = arith.addf %2, %4 : vector<64x32xf32>
    %cst_5 = arith.constant dense<0.000000e+00> : vector<32xf32>
    %6 = vector.multi_reduction <add>, %5, %cst_5 [0] : vector<64x32xf32> to vector<32xf32>
    %7 = vector.shape_cast %6 : vector<32xf32> to vector<1x32xf32>
    %cst_6 = arith.constant 6.400000e+01 : f32
    %8 = vector.broadcast %cst_6 : f32 to vector<1x32xf32>
    %9 = arith.divf %7, %8 : vector<1x32xf32>
    %10 = vector.broadcast %9 : vector<1x32xf32> to vector<64x32xf32>
    %11 = arith.subf %5, %10 : vector<64x32xf32>
    %12 = arith.mulf %11, %11 : vector<64x32xf32>
    %cst_7 = arith.constant dense<0.000000e+00> : vector<32xf32>
    %13 = vector.multi_reduction <add>, %12, %cst_7 [0] : vector<64x32xf32> to vector<32xf32>
    %14 = vector.shape_cast %13 : vector<32xf32> to vector<1x32xf32>
    %cst_8 = arith.constant 6.400000e+01 : f32
    %15 = vector.broadcast %cst_8 : f32 to vector<1x32xf32>
    %16 = arith.divf %14, %15 : vector<1x32xf32>
    %cst_9 = arith.constant 9.99999974E-6 : f32
    %17 = vector.broadcast %cst_9 : f32 to vector<1x32xf32>
    %18 = arith.addf %16, %17 : vector<1x32xf32>
    %19 = math.rsqrt %18 : vector<1x32xf32>
    %c0_10 = arith.constant 0 : index
    %c0_11 = arith.constant 0 : index
    %20 = vector.load %arg4[%c0_10, %c0_11] : memref<1x32xf32, #tpu.memory_space<vmem>>, vector<1x32xf32>
    %21 = vector.broadcast %20 : vector<1x32xf32> to vector<64x32xf32>
    %22 = arith.mulf %21, %11 : vector<64x32xf32>
    %23 = vector.broadcast %19 : vector<1x32xf32> to vector<64x32xf32>
    %24 = arith.mulf %22, %23 : vector<64x32xf32>
    %c0_12 = arith.constant 0 : index
    %c0_13 = arith.constant 0 : index
    %25 = vector.load %arg5[%c0_12, %c0_13] : memref<1x32xf32, #tpu.memory_space<vmem>>, vector<1x32xf32>
    %26 = vector.broadcast %25 : vector<1x32xf32> to vector<64x32xf32>
    %27 = arith.addf %24, %26 : vector<64x32xf32>
    %cst_14 = arith.constant 0.000000e+00 : f32
    %28 = vector.broadcast %cst_14 : f32 to vector<64x32xf32>
    %29 = arith.cmpf ogt, %27, %28 : vector<64x32xf32>
    %cst_15 = arith.constant 0.00999999977 : f32
    %30 = vector.broadcast %cst_15 : f32 to vector<64x32xf32>
    %31 = arith.mulf %30, %27 : vector<64x32xf32>
    %32 = arith.select %29, %27, %31 : vector<64x32xi1>, vector<64x32xf32>
    %c0_16 = arith.constant 0 : index
    %c0_17 = arith.constant 0 : index
    %33 = vector.load %arg6[%c0_16, %c0_17] : memref<32x32xf32, #tpu.memory_space<vmem>>, vector<32x32xf32>
    %cst_18 = arith.constant dense<0.000000e+00> : vector<64x32xf32>
    %34 = tpu.matmul %32, %33, %cst_18 {dimension_numbers = #tpu.dot_dimension_numbers<[1], [0], [0], [1], [0, 0, 1, 1], [], []>} : vector<64x32xf32>, vector<32x32xf32>, vector<64x32xf32> -> vector<64x32xf32>
    %c0_19 = arith.constant 0 : index
    %c0_20 = arith.constant 0 : index
    %35 = vector.load %arg7[%c0_19, %c0_20] : memref<1x32xf32, #tpu.memory_space<vmem>>, vector<1x32xf32>
    %36 = vector.broadcast %35 : vector<1x32xf32> to vector<64x32xf32>
    %37 = arith.addf %34, %36 : vector<64x32xf32>
    %cst_21 = arith.constant dense<0.000000e+00> : vector<32xf32>
    %38 = vector.multi_reduction <add>, %37, %cst_21 [0] : vector<64x32xf32> to vector<32xf32>
    %39 = vector.shape_cast %38 : vector<32xf32> to vector<1x32xf32>
    %cst_22 = arith.constant 6.400000e+01 : f32
    %40 = vector.broadcast %cst_22 : f32 to vector<1x32xf32>
    %41 = arith.divf %39, %40 : vector<1x32xf32>
    %42 = vector.broadcast %41 : vector<1x32xf32> to vector<64x32xf32>
    %43 = arith.subf %37, %42 : vector<64x32xf32>
    %44 = arith.mulf %43, %43 : vector<64x32xf32>
    %cst_23 = arith.constant dense<0.000000e+00> : vector<32xf32>
    %45 = vector.multi_reduction <add>, %44, %cst_23 [0] : vector<64x32xf32> to vector<32xf32>
    %46 = vector.shape_cast %45 : vector<32xf32> to vector<1x32xf32>
    %cst_24 = arith.constant 6.400000e+01 : f32
    %47 = vector.broadcast %cst_24 : f32 to vector<1x32xf32>
    %48 = arith.divf %46, %47 : vector<1x32xf32>
    %cst_25 = arith.constant 9.99999974E-6 : f32
    %49 = vector.broadcast %cst_25 : f32 to vector<1x32xf32>
    %50 = arith.addf %48, %49 : vector<1x32xf32>
    %51 = math.rsqrt %50 : vector<1x32xf32>
    %c0_26 = arith.constant 0 : index
    %c0_27 = arith.constant 0 : index
    %52 = vector.load %arg8[%c0_26, %c0_27] : memref<1x32xf32, #tpu.memory_space<vmem>>, vector<1x32xf32>
    %53 = vector.broadcast %52 : vector<1x32xf32> to vector<64x32xf32>
    %54 = arith.mulf %53, %43 : vector<64x32xf32>
    %55 = vector.broadcast %51 : vector<1x32xf32> to vector<64x32xf32>
    %56 = arith.mulf %54, %55 : vector<64x32xf32>
    %c0_28 = arith.constant 0 : index
    %c0_29 = arith.constant 0 : index
    %57 = vector.load %arg9[%c0_28, %c0_29] : memref<1x32xf32, #tpu.memory_space<vmem>>, vector<1x32xf32>
    %58 = vector.broadcast %57 : vector<1x32xf32> to vector<64x32xf32>
    %59 = arith.addf %56, %58 : vector<64x32xf32>
    %cst_30 = arith.constant 0.000000e+00 : f32
    %60 = vector.broadcast %cst_30 : f32 to vector<64x32xf32>
    %61 = arith.cmpf ogt, %59, %60 : vector<64x32xf32>
    %cst_31 = arith.constant 0.00999999977 : f32
    %62 = vector.broadcast %cst_31 : f32 to vector<64x32xf32>
    %63 = arith.mulf %62, %59 : vector<64x32xf32>
    %64 = arith.select %61, %59, %63 : vector<64x32xi1>, vector<64x32xf32>
    %c0_32 = arith.constant 0 : index
    %c0_33 = arith.constant 0 : index
    %65 = vector.load %arg10[%c0_32, %c0_33] : memref<32x32xf32, #tpu.memory_space<vmem>>, vector<32x32xf32>
    %cst_34 = arith.constant dense<0.000000e+00> : vector<64x32xf32>
    %66 = tpu.matmul %64, %65, %cst_34 {dimension_numbers = #tpu.dot_dimension_numbers<[1], [0], [0], [1], [0, 0, 1, 1], [], []>} : vector<64x32xf32>, vector<32x32xf32>, vector<64x32xf32> -> vector<64x32xf32>
    %c0_35 = arith.constant 0 : index
    %c0_36 = arith.constant 0 : index
    %67 = vector.load %arg11[%c0_35, %c0_36] : memref<1x32xf32, #tpu.memory_space<vmem>>, vector<1x32xf32>
    %68 = vector.broadcast %67 : vector<1x32xf32> to vector<64x32xf32>
    %69 = arith.addf %66, %68 : vector<64x32xf32>
    %cst_37 = arith.constant dense<0.000000e+00> : vector<32xf32>
    %70 = vector.multi_reduction <add>, %69, %cst_37 [0] : vector<64x32xf32> to vector<32xf32>
    %71 = vector.shape_cast %70 : vector<32xf32> to vector<1x32xf32>
    %cst_38 = arith.constant 6.400000e+01 : f32
    %72 = vector.broadcast %cst_38 : f32 to vector<1x32xf32>
    %73 = arith.divf %71, %72 : vector<1x32xf32>
    %74 = vector.broadcast %73 : vector<1x32xf32> to vector<64x32xf32>
    %75 = arith.subf %69, %74 : vector<64x32xf32>
    %76 = arith.mulf %75, %75 : vector<64x32xf32>
    %cst_39 = arith.constant dense<0.000000e+00> : vector<32xf32>
    %77 = vector.multi_reduction <add>, %76, %cst_39 [0] : vector<64x32xf32> to vector<32xf32>
    %78 = vector.shape_cast %77 : vector<32xf32> to vector<1x32xf32>
    %cst_40 = arith.constant 6.400000e+01 : f32
    %79 = vector.broadcast %cst_40 : f32 to vector<1x32xf32>
    %80 = arith.divf %78, %79 : vector<1x32xf32>
    %cst_41 = arith.constant 9.99999974E-6 : f32
    %81 = vector.broadcast %cst_41 : f32 to vector<1x32xf32>
    %82 = arith.addf %80, %81 : vector<1x32xf32>
    %83 = math.rsqrt %82 : vector<1x32xf32>
    %c0_42 = arith.constant 0 : index
    %c0_43 = arith.constant 0 : index
    %84 = vector.load %arg12[%c0_42, %c0_43] : memref<1x32xf32, #tpu.memory_space<vmem>>, vector<1x32xf32>
    %85 = vector.broadcast %84 : vector<1x32xf32> to vector<64x32xf32>
    %86 = arith.mulf %85, %75 : vector<64x32xf32>
    %87 = vector.broadcast %83 : vector<1x32xf32> to vector<64x32xf32>
    %88 = arith.mulf %86, %87 : vector<64x32xf32>
    %c0_44 = arith.constant 0 : index
    %c0_45 = arith.constant 0 : index
    %89 = vector.load %arg13[%c0_44, %c0_45] : memref<1x32xf32, #tpu.memory_space<vmem>>, vector<1x32xf32>
    %90 = vector.broadcast %89 : vector<1x32xf32> to vector<64x32xf32>
    %91 = arith.addf %88, %90 : vector<64x32xf32>
    %cst_46 = arith.constant 0.000000e+00 : f32
    %92 = vector.broadcast %cst_46 : f32 to vector<64x32xf32>
    %93 = arith.cmpf ogt, %91, %92 : vector<64x32xf32>
    %cst_47 = arith.constant 0.00999999977 : f32
    %94 = vector.broadcast %cst_47 : f32 to vector<64x32xf32>
    %95 = arith.mulf %94, %91 : vector<64x32xf32>
    %96 = arith.select %93, %91, %95 : vector<64x32xi1>, vector<64x32xf32>
    %c0_48 = arith.constant 0 : index
    %c0_49 = arith.constant 0 : index
    %97 = vector.load %arg14[%c0_48, %c0_49] : memref<32x1xf32, #tpu.memory_space<vmem>>, vector<32x1xf32>
    %cst_50 = arith.constant dense<0.000000e+00> : vector<64x1xf32>
    %98 = tpu.matmul %96, %97, %cst_50 {dimension_numbers = #tpu.dot_dimension_numbers<[1], [0], [0], [1], [0, 0, 1, 1], [], []>} : vector<64x32xf32>, vector<32x1xf32>, vector<64x1xf32> -> vector<64x1xf32>
    %c0_51 = arith.constant 0 : index
    %c0_52 = arith.constant 0 : index
    %99 = vector.load %arg15[%c0_51, %c0_52] : memref<1x1xf32, #tpu.memory_space<vmem>>, vector<1x1xf32>
    %100 = vector.broadcast %99 : vector<1x1xf32> to vector<64x1xf32>
    %101 = arith.addf %98, %100 : vector<64x1xf32>
    %c0_53 = arith.constant 0 : index
    %c0_54 = arith.constant 0 : index
    %102 = vector.load %arg16[%c0_53, %c0_54] : memref<64x1xf32, #tpu.memory_space<vmem>>, vector<64x1xf32>
    tpu.vector_store %arg16[%c0_53, %c0_54], %101 {strides = array<i32>} : memref<64x1xf32, #tpu.memory_space<vmem>>, vector<64x1xf32>,
    return
  }
  func.func @transform_0(%arg0: i32) -> (i32, i32) {
    %c0_i32 = arith.constant 0 : i32
    %c0_i32_0 = arith.constant 0 : i32
    %c0_i32_1 = arith.constant 0 : i32
    return %c0_i32, %c0_i32_0 : i32, i32
  }
  func.func @transform_1(%arg0: i32) -> (i32, i32) {
    %c0_i32 = arith.constant 0 : i32
    %c0_i32_0 = arith.constant 0 : i32
    %c0_i32_1 = arith.constant 0 : i32
    return %c0_i32, %c0_i32_0 : i32, i32
  }
  func.func @transform_2(%arg0: i32) -> (i32, i32) {
    %c0_i32 = arith.constant 0 : i32
    %c0_i32_0 = arith.constant 0 : i32
    %c0_i32_1 = arith.constant 0 : i32
    return %c0_i32, %c0_i32_0 : i32, i32
  }
  func.func @transform_3(%arg0: i32) -> (i32, i32) {
    %c0_i32 = arith.constant 0 : i32
    %c0_i32_0 = arith.constant 0 : i32
    %c0_i32_1 = arith.constant 0 : i32
    return %c0_i32, %c0_i32_0 : i32, i32
  }
  func.func @transform_4(%arg0: i32) -> (i32, i32) {
    %c0_i32 = arith.constant 0 : i32
    %c0_i32_0 = arith.constant 0 : i32
    %c0_i32_1 = arith.constant 0 : i32
    return %c0_i32, %c0_i32_0 : i32, i32
  }
  func.func @transform_5(%arg0: i32) -> (i32, i32) {
    %c0_i32 = arith.constant 0 : i32
    %c0_i32_0 = arith.constant 0 : i32
    %c0_i32_1 = arith.constant 0 : i32
    return %c0_i32, %c0_i32_0 : i32, i32
  }
  func.func @transform_6(%arg0: i32) -> (i32, i32) {
    %c0_i32 = arith.constant 0 : i32
    %c0_i32_0 = arith.constant 0 : i32
    %c0_i32_1 = arith.constant 0 : i32
    return %c0_i32, %c0_i32_0 : i32, i32
  }
  func.func @transform_7(%arg0: i32) -> (i32, i32) {
    %c0_i32 = arith.constant 0 : i32
    %c0_i32_0 = arith.constant 0 : i32
    %c0_i32_1 = arith.constant 0 : i32
    return %c0_i32, %c0_i32_0 : i32, i32
  }
  func.func @transform_8(%arg0: i32) -> (i32, i32) {
    %c0_i32 = arith.constant 0 : i32
    %c0_i32_0 = arith.constant 0 : i32
    %c0_i32_1 = arith.constant 0 : i32
    return %c0_i32, %c0_i32_0 : i32, i32
  }
  func.func @transform_9(%arg0: i32) -> (i32, i32) {
    %c0_i32 = arith.constant 0 : i32
    %c0_i32_0 = arith.constant 0 : i32
    %c0_i32_1 = arith.constant 0 : i32
    return %c0_i32, %c0_i32_0 : i32, i32
  }
  func.func @transform_10(%arg0: i32) -> (i32, i32) {
    %c0_i32 = arith.constant 0 : i32
    %c0_i32_0 = arith.constant 0 : i32
    %c0_i32_1 = arith.constant 0 : i32
    return %c0_i32, %c0_i32_0 : i32, i32
  }
  func.func @transform_11(%arg0: i32) -> (i32, i32) {
    %c0_i32 = arith.constant 0 : i32
    %c0_i32_0 = arith.constant 0 : i32
    %c0_i32_1 = arith.constant 0 : i32
    return %c0_i32, %c0_i32_0 : i32, i32
  }
  func.func @transform_12(%arg0: i32) -> (i32, i32) {
    %c0_i32 = arith.constant 0 : i32
    %c0_i32_0 = arith.constant 0 : i32
    %c0_i32_1 = arith.constant 0 : i32
    return %c0_i32, %c0_i32_0 : i32, i32
  }
  func.func @transform_13(%arg0: i32) -> (i32, i32) {
    %c0_i32 = arith.constant 0 : i32
    %c0_i32_0 = arith.constant 0 : i32
    %c0_i32_1 = arith.constant 0 : i32
    return %c0_i32, %c0_i32_0 : i32, i32
  }
  func.func @transform_14(%arg0: i32) -> (i32, i32) {
    %c0_i32 = arith.constant 0 : i32
    %c0_i32_0 = arith.constant 0 : i32
    %c0_i32_1 = arith.constant 0 : i32
    return %c0_i32, %c0_i32_0 : i32, i32
  }
  func.func @transform_15(%arg0: i32) -> (i32, i32) {
    %c0_i32 = arith.constant 0 : i32
    %c0_i32_0 = arith.constant 0 : i32
    %c0_i32_1 = arith.constant 0 : i32
    return %c0_i32, %c0_i32_0 : i32, i32
  }
}

</mosaic_0001>

<bundles_post_ra>
// kernel: tpu_custom_call.1
= control target key start
LH: loop header
LB: loop body
LE: loop exit
PB: predicated region body
PF: predicated region fallthrough
CT: control target
= control target key end

     0   :  { %vm72_vm0 = vcmask 523264   ;;  %vm138_vm1 = vcmask 261120   ;;  %v810_v28 = vmov 64.0   ;;  %s1190_s1 = inlined_call_operand.vmem [shape: f32[64,32], index: 1, kind: input, shape index: {}]   ;;  %s1191_s2 = inlined_call_operand.vmem [shape: f32[1,32], index: 2, kind: input, shape index: {}]   ;;  %s1192_s0 = inlined_call_operand.vmem [shape: f32[64,64], index: 0, kind: input, shape index: {}]   ;;  %s1193_s3 = inlined_call_operand.vmem [shape: f32[1,32], index: 3, kind: input, shape index: {}]   ;;  %s1194_s4 = inlined_call_operand.vmem [shape: f32[1,32], index: 4, kind: input, shape index: {}]   ;;  %s1195_s6 = inlined_call_operand.vmem [shape: f32[1,32], index: 6, kind: input, shape index: {}]   ;;  %s1196_s5 = inlined_call_operand.vmem [shape: f32[32,32], index: 5, kind: input, shape index: {}]   ;;  %s1197_s7 = inlined_call_operand.vmem [shape: f32[1,32], index: 7, kind: input, shape index: {}]   ;;  %s1198_s8 = inlined_call_operand.vmem [shape: f32[1,32], index: 8, kind: input, shape index: {}]   ;;  %s1199_s10 = inlined_call_operand.vmem [shape: f32[1,32], index: 10, kind: input, shape index: {}]   ;;  %s1200_s9 = inlined_call_operand.vmem [shape: f32[32,32], index: 9, kind: input, shape index: {}]   ;;  %s1201_s11 = inlined_call_operand.vmem [shape: f32[1,32], index: 11, kind: input, shape index: {}]   ;;  %s1202_s12 = inlined_call_operand.vmem [shape: f32[1,32], index: 12, kind: input, shape index: {}]   ;;  %s1203_s13 = inlined_call_operand.vmem [shape: f32[32,1], index: 13, kind: input, shape index: {}]   ;;  %s1204_s14 = inlined_call_operand.<no memory space> [shape: f32[1,1], index: 14, kind: input, shape index: {}]   ;;  %s1205_s15 = inlined_call_operand.vmem [shape: f32[64,1], index: 15, kind: output, shape index: {}]  }
   0x1   :  { %v67_v0 = vld [vmem:[%s1190_s1 + $0x38] sm:$0xff]  ;;  %v66_v1 = vld [vmem:[%s1190_s1 + $0x30] sm:$0xff]  ;;  %v65_v2 = vld [vmem:[%s1190_s1 + $0x28] sm:$0xff]  ;;  %802 = vrcp.f32 %v810_v28 }
   0x2   :  { %105 = vmatpush.msra.mxu0 %v67_v0  ;;  %v64_v3 = vld [vmem:[%s1190_s1 + $0x20] sm:$0xff]  ;;  %v63_v4 = vld [vmem:[%s1190_s1 + $0x18] sm:$0xff]  ;;  %v62_v5 = vld [vmem:[%s1190_s1 + $0x10] sm:$0xff] }
   0x3   :  { %v61_v6 = vld [vmem:[%s1190_s1 + $0x8] sm:$0xff]  ;;  %v60_v7 = vld [vmem:[%s1190_s1] sm:$0xff]  ;;  %v54_v10 = vld [vmem:[%s1192_s0 + $0x10] sm:$0xff] }
   0x4   :  { %106 = vmatpush.msra.mxu0 %v66_v1  ;;  %v52_v8 = vld [vmem:[%s1192_s0] sm:$0xff]  ;;  %v53_v9 = vld [vmem:[%s1192_s0 + $0x8] sm:$0xff]  ;;  %v55_v11 = vld [vmem:[%s1192_s0 + $0x18] sm:$0xff] }
   0x5   :  { %v56_v12 = vld [vmem:[%s1192_s0 + $0x20] sm:$0xff]  ;;  %v57_v13 = vld [vmem:[%s1192_s0 + $0x28] sm:$0xff]  ;;  %v58_v14 = vld [vmem:[%s1192_s0 + $0x30] sm:$0xff] }
   0x6   :  { %107 = vmatpush.msra.mxu0 %v65_v2  ;;  %v59_v15 = vld [vmem:[%s1192_s0 + $0x38] sm:$0xff]  ;;  %v792_v21 = vld [vmem:[%s1191_s2] ss:$0 sm:$0xff] }
   0x7   :  { %v803_v39 = vpop.eup %802 }
   0x8   :  { %108 = vmatpush.msra.mxu0 %v64_v3  ;;  %v161_v44 = vmul.f32 64.0, %v803_v39  ;;  %vm165_vm2 = vweird.f32 %v803_v39 }
   0xa   :  { %109 = vmatpush.msra.mxu0 %v63_v4  ;;  %v162_v50 = vsub.f32 1.0, %v161_v44 }
   0xc   :  { %110 = vmatpush.msra.mxu0 %v62_v5  ;;  %v163_v53 = vmul.f32 %v803_v39, %v162_v50  ;;  %v794_v50 = vld [vmem:[%s1194_s4] ss:$0 sm:$0xff] }
   0xe   :  { %111 = vmatpush.msra.mxu0 %v61_v6  ;;  %v164_v56 = vadd.f32 %v803_v39, %v163_v53 }
  0x10   :  { %112 = vmatpush.msra.mxu0 %v60_v7  ;;  %v958_v59 = vsel %vm165_vm2, %v803_v39, %v164_v56 }
  0x11   :  { %759 = vmatmul.msk.f32.vlgmr.msra.gmra.mxu0 %vm72_vm0, %v52_v8 }
  0x19   :  { %760 = vmatmul.msk.f32.gmra.mxu0 %vm72_vm0, %v53_v9 }
  0x21   :  { %761 = vmatmul.msk.f32.gmra.mxu0 %vm72_vm0, %v54_v10 }
  0x29   :  { %762 = vmatmul.msk.f32.gmra.mxu0 %vm72_vm0, %v55_v11 }
  0x31   :  { %763 = vmatmul.msk.f32.gmra.mxu0 %vm72_vm0, %v56_v12 }
  0x39   :  { %764 = vmatmul.msk.f32.gmra.mxu0 %vm72_vm0, %v57_v13 }
  0x41   :  { %765 = vmatmul.msk.f32.gmra.mxu0 %vm72_vm0, %v58_v14 }
  0x49   :  { %766 = vmatmul.msk.f32.gmra.mxu0 %vm72_vm0, %v59_v15 }
  0x8e   :  { %v114_v16 = vpop.f32.mrf.mxu0 }
  0x8f   :  { %v115_v24 = vadd.f32 %v792_v21, %v114_v16 }
  0x91   :  { %v139_v29 = vsel %vm138_vm1, %v115_v24, 0.0 }
  0x96   :  { %v117_v17 = vpop.f32.mrf.mxu0 }
  0x97   :  { %v118_v23 = vadd.f32 %v792_v21, %v117_v17 }
  0x99   :  { %v140_v26 = vsel %vm138_vm1, %v118_v23, 0.0 }
  0x9a   :  { %v141_v32 = vadd.f32 %v140_v26, %v139_v29 }
  0x9e   :  { %v120_v18 = vpop.f32.mrf.mxu0 }
  0x9f   :  { %v121_v25 = vadd.f32 %v792_v21, %v120_v18 }
  0xa1   :  { %v142_v30 = vsel %vm138_vm1, %v121_v25, 0.0 }
  0xa2   :  { %v143_v36 = vadd.f32 %v142_v30, %v141_v32  ;;  %v275_v32 = vld [vmem:[%s1196_s5 + $0x10] sm:$0xff] }
  0xa6   :  { %v123_v19 = vpop.f32.mrf.mxu0 }
  0xa7   :  { %v124_v27 = vadd.f32 %v792_v21, %v123_v19 }
  0xa9   :  { %v144_v34 = vsel %vm138_vm1, %v124_v27, 0.0 }
  0xaa   :  { %v145_v40 = vadd.f32 %v144_v34, %v143_v36  ;;  %v274_v34 = vld [vmem:[%s1196_s5 + $0x8] sm:$0xff]  ;;  %v273_v36 = vld [vmem:[%s1196_s5] sm:$0xff] }
  0xae   :  { %v126_v20 = vpop.f32.mrf.mxu0 }
  0xaf   :  { %v127_v31 = vadd.f32 %v792_v21, %v126_v20 }
  0xb1   :  { %v146_v37 = vsel %vm138_vm1, %v127_v31, 0.0 }
  0xb2   :  { %v147_v42 = vadd.f32 %v146_v37, %v145_v40 }
  0xb6   :  { %v129_v22 = vpop.f32.mrf.mxu0 }
  0xb7   :  { %v130_v35 = vadd.f32 %v792_v21, %v129_v22 }
  0xb9   :  { %v148_v41 = vsel %vm138_vm1, %v130_v35, 0.0 }
  0xba   :  { %v149_v45 = vadd.f32 %v148_v41, %v147_v42 }
  0xbe   :  { %v132_v33 = vpop.f32.mrf.mxu0 }
  0xbf   :  { %v133_v38 = vadd.f32 %v792_v21, %v132_v33 }
  0xc1   :  { %v150_v43 = vsel %vm138_vm1, %v133_v38, 0.0 }
  0xc2   :  { %v151_v48 = vadd.f32 %v150_v43, %v149_v45  ;;  %v793_v45 = vld [vmem:[%s1193_s3] ss:$0 sm:$0xff] }
  0xc6   :  { %v135_v46 = vpop.f32.mrf.mxu0 }
  0xc7   :  { %v136_v47 = vadd.f32 %v792_v21, %v135_v46 }
  0xc9   :  { %v152_v49 = vsel %vm138_vm1, %v136_v47, 0.0 }
  0xca   :  { %v153_v51 = vadd.f32 %v152_v49, %v151_v48 }
  0xcc   :  { %v154_v52 = vrot.slane %v153_v51, 4 }
  0xce   :  { %v155_v54 = vadd.f32 %v154_v52, %v153_v51 }
  0xd0   :  { %v156_v55 = vrot.slane %v155_v54, 2 }
  0xd2   :  { %v157_v57 = vadd.f32 %v156_v55, %v155_v54 }
  0xd4   :  { %v158_v58 = vrot.slane %v157_v57, 1 }
  0xd6   :  { %v159_v60 = vadd.f32 %v158_v58, %v157_v57 }
  0xd8   :  { %v167_v61 = vmul.f32 %v958_v59, %v159_v60 }
  0xda   :  { %v168_v62 = vsub.f32 %v115_v24, %v167_v61  ;;  %v961_v63 = vsub.f32 %v118_v23, %v167_v61  ;;  %v170_v0 = vsub.f32 %v121_v25, %v167_v61  ;;  %v171_v1 = vsub.f32 %v124_v27, %v167_v61 }
  0xdb   :  { %v172_v2 = vsub.f32 %v127_v31, %v167_v61  ;;  %v173_v6 = vsub.f32 %v130_v35, %v167_v61  ;;  %v174_v11 = vsub.f32 %v133_v38, %v167_v61  ;;  %v175_v15 = vsub.f32 %v136_v47, %v167_v61  ;;  %v276_v31 = vld [vmem:[%s1196_s5 + $0x18] sm:$0xff] }
  0xdc   :  { %v176_v3 = vmul.f32 %v168_v62, %v168_v62  ;;  %v177_v4 = vmul.f32 %v961_v63, %v961_v63  ;;  %v178_v5 = vmul.f32 %v170_v0, %v170_v0  ;;  %v179_v7 = vmul.f32 %v171_v1, %v171_v1  ;;  %317 = vmatpush.msra.mxu1 %v276_v31 }
  0xdd   :  { %v180_v12 = vmul.f32 %v172_v2, %v172_v2  ;;  %v181_v16 = vmul.f32 %v173_v6, %v173_v6  ;;  %v182_v19 = vmul.f32 %v174_v11, %v174_v11  ;;  %v183_v22 = vmul.f32 %v175_v15, %v175_v15 }
  0xde   :  { %v184_v8 = vsel %vm138_vm1, %v176_v3, 0.0  ;;  %v185_v9 = vsel %vm138_vm1, %v177_v4, 0.0  ;;  %v187_v13 = vsel %vm138_vm1, %v178_v5, 0.0  ;;  %v189_v17 = vsel %vm138_vm1, %v179_v7, 0.0  ;;  %318 = vmatpush.msra.mxu1 %v275_v32  ;;  %v795_v32 = vld [vmem:[%s1195_s6] ss:$0 sm:$0xff] }
  0xdf   :  { %v186_v10 = vadd.f32 %v185_v9, %v184_v8  ;;  %v191_v20 = vsel %vm138_vm1, %v180_v12, 0.0  ;;  %v193_v23 = vsel %vm138_vm1, %v181_v16, 0.0  ;;  %v195_v25 = vsel %vm138_vm1, %v182_v19, 0.0 }
  0xe0   :  { %v197_v27 = vsel %vm138_vm1, %v183_v22, 0.0  ;;  %319 = vmatpush.msra.mxu1 %v274_v34  ;;  %v228_v48 = vmul.f32 %v793_v45, %v175_v15  ;;  %v221_v49 = vmul.f32 %v793_v45, %v168_v62  ;;  %v223_v51 = vmul.f32 %v793_v45, %v170_v0 }
  0xe1   :  { %v188_v14 = vadd.f32 %v187_v13, %v186_v10  ;;  %v224_v52 = vmul.f32 %v793_v45, %v171_v1  ;;  %v225_v54 = vmul.f32 %v793_v45, %v172_v2  ;;  %v226_v55 = vmul.f32 %v793_v45, %v173_v6 }
  0xe2   :  { %320 = vmatpush.msra.mxu1 %v273_v36  ;;  %v227_v56 = vmul.f32 %v793_v45, %v174_v11  ;;  %v222_v60 = vmul.f32 %v793_v45, %v961_v63 }
  0xe3   :  { %v190_v18 = vadd.f32 %v189_v17, %v188_v14 }
  0xe5   :  { %v192_v21 = vadd.f32 %v191_v20, %v190_v18 }
  0xe7   :  { %v194_v24 = vadd.f32 %v193_v23, %v192_v21 }
  0xe9   :  { %v196_v26 = vadd.f32 %v195_v25, %v194_v24 }
  0xeb   :  { %v198_v28 = vadd.f32 %v197_v27, %v196_v26 }
  0xed   :  { %v199_v29 = vrot.slane %v198_v28, 4 }
  0xef   :  { %v200_v30 = vadd.f32 %v199_v29, %v198_v28 }
  0xf1   :  { %v201_v33 = vrot.slane %v200_v30, 2 }
  0xf3   :  { %v202_v35 = vadd.f32 %v201_v33, %v200_v30 }
  0xf5   :  { %v203_v37 = vrot.slane %v202_v35, 1 }
  0xf7   :  { %v204_v38 = vadd.f32 %v203_v37, %v202_v35 }
  0xf9   :  { %v205_v39 = vmul.f32 %v204_v38, %v958_v59 }
  0xfb   :  { %v206_v40 = vadd.f32 1e-05, %v205_v39 }
  0xfd   :  { %804 = vrsqrt.f32 %v206_v40  ;;  %vm213_vm4 = vweird.f32 %v206_v40 }
 0x103   :  { %v805_v41 = vpop.eup %804 }
 0x104   :  { %v208_v42 = vmul.f32 %v805_v41, %v206_v40  ;;  %vm214_vm3 = vweird.f32 %v805_v41 }
 0x105   :  { %vm215_vm5 = vmor %vm213_vm4, %vm214_vm3 }
 0x106   :  { %v209_v43 = vmul.f32 %v805_v41, %v208_v42 }
 0x108   :  { %v210_v44 = vmul.f32 0.5, %v209_v43 }
 0x10a   :  { %v211_v46 = vsub.f32 1.5, %v210_v44 }
 0x10c   :  { %v212_v47 = vmul.f32 %v805_v41, %v211_v46 }
 0x10e   :  { %v216_v53 = vsel %vm215_vm5, %v805_v41, %v212_v47 }
 0x10f   :  { %v236_v57 = vmul.f32 %v228_v48, %v216_v53  ;;  %v229_v58 = vmul.f32 %v221_v49, %v216_v53  ;;  %v231_v61 = vmul.f32 %v223_v51, %v216_v53  ;;  %v232_v3 = vmul.f32 %v224_v52, %v216_v53 }
 0x110   :  { %v233_v4 = vmul.f32 %v225_v54, %v216_v53  ;;  %v234_v5 = vmul.f32 %v226_v55, %v216_v53  ;;  %v235_v7 = vmul.f32 %v227_v56, %v216_v53  ;;  %v230_v8 = vmul.f32 %v222_v60, %v216_v53 }
 0x111   :  { %v241_v62 = vadd.f32 %v794_v50, %v229_v58  ;;  %v243_v6 = vadd.f32 %v794_v50, %v231_v61  ;;  %v244_v12 = vadd.f32 %v794_v50, %v232_v3  ;;  %v248_v24 = vadd.f32 %v794_v50, %v236_v57 }
 0x112   :  { %v242_v0 = vadd.f32 %v794_v50, %v230_v8  ;;  %v245_v15 = vadd.f32 %v794_v50, %v233_v4  ;;  %v246_v18 = vadd.f32 %v794_v50, %v234_v5  ;;  %v247_v21 = vadd.f32 %v794_v50, %v235_v7 }
 0x113   :  { %vm249_vm6 = vcmp.gt.f32.partialorder %v241_v62, 0.0  ;;  %v257_v9 = vmul.f32 0.01, %v241_v62  ;;  %v259_v63 = vmul.f32 0.01, %v243_v6  ;;  %vm251_vm8 = vcmp.gt.f32.partialorder %v243_v6, 0.0 }
 0x114   :  { %v258_v1 = vmul.f32 0.01, %v242_v0  ;;  %vm250_vm7 = vcmp.gt.f32.partialorder %v242_v0, 0.0  ;;  %v260_v13 = vmul.f32 0.01, %v244_v12  ;;  %vm252_vm9 = vcmp.gt.f32.partialorder %v244_v12, 0.0 }
 0x115   :  { %v265_v10 = vsel %vm249_vm6, %v241_v62, %v257_v9  ;;  %v267_v11 = vsel %vm251_vm8, %v243_v6, %v259_v63  ;;  %v261_v16 = vmul.f32 0.01, %v245_v15  ;;  %vm253_vm10 = vcmp.gt.f32.partialorder %v245_v15, 0.0 }
 0x116   :  { %767 = vmatmul.msk.f32.vlgmr.msra.gmra.mxu1 %vm138_vm1, %v265_v10  ;;  %v266_v2 = vsel %vm250_vm7, %v242_v0, %v258_v1  ;;  %v268_v14 = vsel %vm252_vm9, %v244_v12, %v260_v13  ;;  %v262_v19 = vmul.f32 0.01, %v246_v18  ;;  %vm254_vm11 = vcmp.gt.f32.partialorder %v246_v18, 0.0 }
 0x117   :  { %v269_v17 = vsel %vm253_vm10, %v245_v15, %v261_v16  ;;  %v263_v22 = vmul.f32 0.01, %v247_v21  ;;  %vm255_vm12 = vcmp.gt.f32.partialorder %v247_v21, 0.0  ;;  %v264_v25 = vmul.f32 0.01, %v248_v24 }
 0x118   :  { %v270_v20 = vsel %vm254_vm11, %v246_v18, %v262_v19  ;;  %vm256_vm13 = vcmp.gt.f32.partialorder %v248_v24, 0.0 }
 0x119   :  { %v271_v23 = vsel %vm255_vm12, %v247_v21, %v263_v22  ;;  %v272_v26 = vsel %vm256_vm13, %v248_v24, %v264_v25 }
 0x11e   :  { %768 = vmatmul.msk.f32.gmra.mxu1 %vm138_vm1, %v266_v2 }
 0x126   :  { %769 = vmatmul.msk.f32.gmra.mxu1 %vm138_vm1, %v267_v11 }
 0x12e   :  { %770 = vmatmul.msk.f32.gmra.mxu1 %vm138_vm1, %v268_v14 }
 0x136   :  { %771 = vmatmul.msk.f32.gmra.mxu1 %vm138_vm1, %v269_v17 }
 0x13e   :  { %772 = vmatmul.msk.f32.gmra.mxu1 %vm138_vm1, %v270_v20 }
 0x146   :  { %773 = vmatmul.msk.f32.gmra.mxu1 %vm138_vm1, %v271_v23 }
 0x14e   :  { %774 = vmatmul.msk.f32.gmra.mxu1 %vm138_vm1, %v272_v26 }
 0x193   :  { %v322_v27 = vpop.f32.mrf.mxu1 }
 0x194   :  { %v323_v35 = vadd.f32 %v795_v32, %v322_v27 }
 0x196   :  { %v346_v39 = vsel %vm138_vm1, %v323_v35, 0.0 }
 0x19b   :  { %v325_v28 = vpop.f32.mrf.mxu1 }
 0x19c   :  { %v326_v34 = vadd.f32 %v795_v32, %v325_v28 }
 0x19e   :  { %v347_v37 = vsel %vm138_vm1, %v326_v34, 0.0 }
 0x19f   :  { %v348_v42 = vadd.f32 %v347_v37, %v346_v39  ;;  %v475_v37 = vld [vmem:[%s1200_s9 + $0x10] sm:$0xff]  ;;  %v474_v39 = vld [vmem:[%s1200_s9 + $0x8] sm:$0xff] }
 0x1a3   :  { %v328_v29 = vpop.f32.mrf.mxu1 }
 0x1a4   :  { %v329_v36 = vadd.f32 %v795_v32, %v328_v29 }
 0x1a6   :  { %v349_v40 = vsel %vm138_vm1, %v329_v36, 0.0 }
 0x1a7   :  { %v350_v46 = vadd.f32 %v349_v40, %v348_v42 }
 0x1ab   :  { %v331_v30 = vpop.f32.mrf.mxu1 }
 0x1ac   :  { %v332_v38 = vadd.f32 %v795_v32, %v331_v30 }
 0x1ae   :  { %v351_v44 = vsel %vm138_vm1, %v332_v38, 0.0 }
 0x1af   :  { %v352_v49 = vadd.f32 %v351_v44, %v350_v46 }
 0x1b3   :  { %v334_v31 = vpop.f32.mrf.mxu1 }
 0x1b4   :  { %v335_v41 = vadd.f32 %v795_v32, %v334_v31 }
 0x1b6   :  { %v353_v47 = vsel %vm138_vm1, %v335_v41, 0.0 }
 0x1b7   :  { %v354_v51 = vadd.f32 %v353_v47, %v352_v49 }
 0x1bb   :  { %v337_v33 = vpop.f32.mrf.mxu1 }
 0x1bc   :  { %v338_v45 = vadd.f32 %v795_v32, %v337_v33 }
 0x1be   :  { %v355_v50 = vsel %vm138_vm1, %v338_v45, 0.0 }
 0x1bf   :  { %v356_v53 = vadd.f32 %v355_v50, %v354_v51  ;;  %v796_v50 = vld [vmem:[%s1197_s7] ss:$0 sm:$0xff] }
 0x1c3   :  { %v340_v43 = vpop.f32.mrf.mxu1 }
 0x1c4   :  { %v341_v48 = vadd.f32 %v795_v32, %v340_v43 }
 0x1c6   :  { %v357_v52 = vsel %vm138_vm1, %v341_v48, 0.0 }
 0x1c7   :  { %v358_v56 = vadd.f32 %v357_v52, %v356_v53 }
 0x1cb   :  { %v343_v54 = vpop.f32.mrf.mxu1 }
 0x1cc   :  { %v344_v55 = vadd.f32 %v795_v32, %v343_v54  ;;  %v797_v54 = vld [vmem:[%s1198_s8] ss:$0 sm:$0xff] }
 0x1ce   :  { %v359_v57 = vsel %vm138_vm1, %v344_v55, 0.0 }
 0x1cf   :  { %v360_v58 = vadd.f32 %v359_v57, %v358_v56 }
 0x1d1   :  { %v361_v60 = vrot.slane %v360_v58, 4 }
 0x1d3   :  { %v362_v61 = vadd.f32 %v361_v60, %v360_v58 }
 0x1d5   :  { %v363_v3 = vrot.slane %v362_v61, 2 }
 0x1d7   :  { %v364_v4 = vadd.f32 %v363_v3, %v362_v61 }
 0x1d9   :  { %v365_v5 = vrot.slane %v364_v4, 1 }
 0x1db   :  { %v366_v7 = vadd.f32 %v365_v5, %v364_v4 }
 0x1dd   :  { %v367_v62 = vmul.f32 %v366_v7, %v958_v59 }
 0x1df   :  { %v368_v8 = vsub.f32 %v323_v35, %v367_v62  ;;  %v369_v9 = vsub.f32 %v326_v34, %v367_v62  ;;  %v1013_v10 = vsub.f32 %v329_v36, %v367_v62  ;;  %v1015_v0 = vsub.f32 %v332_v38, %v367_v62  ;;  %v476_v36 = vld [vmem:[%s1200_s9 + $0x18] sm:$0xff] }
 0x1e0   :  { %v1017_v1 = vsub.f32 %v335_v41, %v367_v62  ;;  %v1021_v11 = vsub.f32 %v338_v45, %v367_v62  ;;  %v1027_v16 = vsub.f32 %v341_v48, %v367_v62  ;;  %v1032_v20 = vsub.f32 %v344_v55, %v367_v62  ;;  %517 = vmatpush.msra.mxu2 %v476_v36  ;;  %v473_v41 = vld [vmem:[%s1200_s9] sm:$0xff] }
 0x1e1   :  { %v376_v2 = vmul.f32 %v368_v8, %v368_v8  ;;  %v377_v6 = vmul.f32 %v369_v9, %v369_v9  ;;  %v378_v63 = vmul.f32 %v1013_v10, %v1013_v10  ;;  %v379_v12 = vmul.f32 %v1015_v0, %v1015_v0 }
 0x1e2   :  { %v380_v17 = vmul.f32 %v1017_v1, %v1017_v1  ;;  %v381_v21 = vmul.f32 %v1021_v11, %v1021_v11  ;;  %v382_v24 = vmul.f32 %v1027_v16, %v1027_v16  ;;  %v383_v27 = vmul.f32 %v1032_v20, %v1032_v20  ;;  %518 = vmatpush.msra.mxu2 %v475_v37 }
 0x1e3   :  { %v384_v13 = vsel %vm138_vm1, %v376_v2, 0.0  ;;  %v385_v14 = vsel %vm138_vm1, %v377_v6, 0.0  ;;  %v387_v18 = vsel %vm138_vm1, %v378_v63, 0.0  ;;  %v389_v22 = vsel %vm138_vm1, %v379_v12, 0.0 }
 0x1e4   :  { %v386_v15 = vadd.f32 %v385_v14, %v384_v13  ;;  %v391_v25 = vsel %vm138_vm1, %v380_v17, 0.0  ;;  %v393_v28 = vsel %vm138_vm1, %v381_v21, 0.0  ;;  %v395_v30 = vsel %vm138_vm1, %v382_v24, 0.0  ;;  %519 = vmatpush.msra.mxu2 %v474_v39 }
 0x1e5   :  { %v397_v32 = vsel %vm138_vm1, %v383_v27, 0.0  ;;  %v421_v53 = vmul.f32 %v796_v50, %v368_v8  ;;  %v422_v57 = vmul.f32 %v796_v50, %v369_v9  ;;  %v423_v5 = vmul.f32 %v796_v50, %v1013_v10 }
 0x1e6   :  { %v388_v19 = vadd.f32 %v387_v18, %v386_v15  ;;  %520 = vmatpush.msra.mxu2 %v473_v41  ;;  %v424_v6 = vmul.f32 %v796_v50, %v1015_v0  ;;  %v425_v14 = vmul.f32 %v796_v50, %v1017_v1  ;;  %v427_v24 = vmul.f32 %v796_v50, %v1027_v16 }
 0x1e8   :  { %v390_v23 = vadd.f32 %v389_v22, %v388_v19  ;;  %v426_v19 = vmul.f32 %v796_v50, %v1021_v11 }
 0x1ea   :  { %v392_v26 = vadd.f32 %v391_v25, %v390_v23 }
 0x1ec   :  { %v394_v29 = vadd.f32 %v393_v28, %v392_v26  ;;  %v428_v28 = vmul.f32 %v796_v50, %v1032_v20  ;;  %v798_v20 = vld [vmem:[%s1199_s10] ss:$0 sm:$0xff] }
 0x1ee   :  { %v396_v31 = vadd.f32 %v395_v30, %v394_v29 }
 0x1f0   :  { %v398_v33 = vadd.f32 %v397_v32, %v396_v31 }
 0x1f2   :  { %v399_v34 = vrot.slane %v398_v33, 4 }
 0x1f4   :  { %v400_v35 = vadd.f32 %v399_v34, %v398_v33 }
 0x1f6   :  { %v401_v38 = vrot.slane %v400_v35, 2 }
 0x1f8   :  { %v402_v40 = vadd.f32 %v401_v38, %v400_v35 }
 0x1fa   :  { %v403_v42 = vrot.slane %v402_v40, 1 }
 0x1fc   :  { %v404_v43 = vadd.f32 %v403_v42, %v402_v40 }
 0x1fe   :  { %v405_v44 = vmul.f32 %v404_v43, %v958_v59 }
 0x200   :  { %v406_v45 = vadd.f32 1e-05, %v405_v44 }
 0x202   :  { %806 = vrsqrt.f32 %v406_v45  ;;  %vm413_vm15 = vweird.f32 %v406_v45 }
 0x208   :  { %v807_v46 = vpop.eup %806 }
 0x209   :  { %v408_v47 = vmul.f32 %v807_v46, %v406_v45  ;;  %vm414_vm14 = vweird.f32 %v807_v46 }
 0x20a   :  { %vm415_vm0 = vmor %vm413_vm15, %vm414_vm14 }
 0x20b   :  { %v409_v48 = vmul.f32 %v807_v46, %v408_v47 }
 0x20d   :  { %v410_v49 = vmul.f32 0.5, %v409_v48 }
 0x20f   :  { %v411_v51 = vsub.f32 1.5, %v410_v49 }
 0x211   :  { %v412_v52 = vmul.f32 %v807_v46, %v411_v51 }
 0x213   :  { %v416_v55 = vsel %vm415_vm0, %v807_v46, %v412_v52 }
 0x214   :  { %v429_v56 = vmul.f32 %v421_v53, %v416_v55  ;;  %v430_v60 = vmul.f32 %v422_v57, %v416_v55  ;;  %v431_v62 = vmul.f32 %v423_v5, %v416_v55  ;;  %v432_v63 = vmul.f32 %v424_v6, %v416_v55 }
 0x215   :  { %v433_v10 = vmul.f32 %v425_v14, %v416_v55  ;;  %v434_v0 = vmul.f32 %v426_v19, %v416_v55  ;;  %v435_v1 = vmul.f32 %v427_v24, %v416_v55  ;;  %v436_v29 = vmul.f32 %v428_v28, %v416_v55 }
 0x216   :  { %v441_v58 = vadd.f32 %v797_v54, %v429_v56  ;;  %v442_v4 = vadd.f32 %v797_v54, %v430_v60  ;;  %v443_v2 = vadd.f32 %v797_v54, %v431_v62  ;;  %v444_v13 = vadd.f32 %v797_v54, %v432_v63 }
 0x217   :  { %v445_v18 = vadd.f32 %v797_v54, %v433_v10  ;;  %v446_v23 = vadd.f32 %v797_v54, %v434_v0  ;;  %v447_v27 = vadd.f32 %v797_v54, %v435_v1  ;;  %v448_v31 = vadd.f32 %v797_v54, %v436_v29 }
 0x218   :  { %vm449_vm2 = vcmp.gt.f32.partialorder %v441_v58, 0.0  ;;  %v457_v61 = vmul.f32 0.01, %v441_v58  ;;  %v458_v7 = vmul.f32 0.01, %v442_v4  ;;  %vm450_vm3 = vcmp.gt.f32.partialorder %v442_v4, 0.0 }
 0x219   :  { %v459_v9 = vmul.f32 0.01, %v443_v2  ;;  %vm451_vm4 = vcmp.gt.f32.partialorder %v443_v2, 0.0  ;;  %v460_v15 = vmul.f32 0.01, %v444_v13  ;;  %vm452_vm5 = vcmp.gt.f32.partialorder %v444_v13, 0.0 }
 0x21a   :  { %v465_v3 = vsel %vm449_vm2, %v441_v58, %v457_v61  ;;  %v466_v8 = vsel %vm450_vm3, %v442_v4, %v458_v7  ;;  %v461_v21 = vmul.f32 0.01, %v445_v18  ;;  %vm453_vm6 = vcmp.gt.f32.partialorder %v445_v18, 0.0 }
 0x21b   :  { %775 = vmatmul.msk.f32.vlgmr.msra.gmra.mxu2 %vm138_vm1, %v465_v3  ;;  %v467_v12 = vsel %vm451_vm4, %v443_v2, %v459_v9  ;;  %v468_v17 = vsel %vm452_vm5, %v444_v13, %v460_v15  ;;  %v462_v25 = vmul.f32 0.01, %v446_v23  ;;  %vm454_vm7 = vcmp.gt.f32.partialorder %v446_v23, 0.0 }
 0x21c   :  { %v469_v22 = vsel %vm453_vm6, %v445_v18, %v461_v21  ;;  %v463_v11 = vmul.f32 0.01, %v447_v27  ;;  %vm455_vm8 = vcmp.gt.f32.partialorder %v447_v27, 0.0  ;;  %v464_v32 = vmul.f32 0.01, %v448_v31 }
 0x21d   :  { %v470_v26 = vsel %vm454_vm7, %v446_v23, %v462_v25  ;;  %vm456_vm9 = vcmp.gt.f32.partialorder %v448_v31, 0.0  ;;  %vm746_vm6 = vcmask 7168  }
 0x21e   :  { %v471_v30 = vsel %vm455_vm8, %v447_v27, %v463_v11  ;;  %v472_v33 = vsel %vm456_vm9, %v448_v31, %v464_v32 }
 0x223   :  { %776 = vmatmul.msk.f32.gmra.mxu2 %vm138_vm1, %v466_v8 }
 0x22b   :  { %777 = vmatmul.msk.f32.gmra.mxu2 %vm138_vm1, %v467_v12 }
 0x233   :  { %778 = vmatmul.msk.f32.gmra.mxu2 %vm138_vm1, %v468_v17 }
 0x23b   :  { %779 = vmatmul.msk.f32.gmra.mxu2 %vm138_vm1, %v469_v22 }
 0x243   :  { %780 = vmatmul.msk.f32.gmra.mxu2 %vm138_vm1, %v470_v26 }
 0x24b   :  { %781 = vmatmul.msk.f32.gmra.mxu2 %vm138_vm1, %v471_v30 }
 0x253   :  { %782 = vmatmul.msk.f32.gmra.mxu2 %vm138_vm1, %v472_v33 }
 0x29e   :  { %v522_v16 = vpop.f32.mrf.mxu2 }
 0x29f   :  { %v523_v40 = vadd.f32 %v798_v20, %v522_v16 }
 0x2a1   :  { %v546_v44 = vsel %vm138_vm1, %v523_v40, 0.0 }
 0x2a6   :  { %v525_v34 = vpop.f32.mrf.mxu2 }
 0x2a7   :  { %v526_v39 = vadd.f32 %v798_v20, %v525_v34 }
 0x2a9   :  { %v547_v42 = vsel %vm138_vm1, %v526_v39, 0.0 }
 0x2aa   :  { %v548_v47 = vadd.f32 %v547_v42, %v546_v44  ;;  %v675_v42 = vld [vmem:[%s1203_s13 + $0x10] sm:$0xff]  ;;  %v674_v44 = vld [vmem:[%s1203_s13 + $0x8] sm:$0xff] }
 0x2ae   :  { %v528_v35 = vpop.f32.mrf.mxu2 }
 0x2af   :  { %v529_v41 = vadd.f32 %v798_v20, %v528_v35 }
 0x2b1   :  { %v549_v45 = vsel %vm138_vm1, %v529_v41, 0.0 }
 0x2b2   :  { %v550_v51 = vadd.f32 %v549_v45, %v548_v47 }
 0x2b6   :  { %v531_v36 = vpop.f32.mrf.mxu2 }
 0x2b7   :  { %v532_v43 = vadd.f32 %v798_v20, %v531_v36 }
 0x2b9   :  { %v551_v49 = vsel %vm138_vm1, %v532_v43, 0.0 }
 0x2ba   :  { %v552_v54 = vadd.f32 %v551_v49, %v550_v51 }
 0x2be   :  { %v534_v37 = vpop.f32.mrf.mxu2 }
 0x2bf   :  { %v535_v46 = vadd.f32 %v798_v20, %v534_v37 }
 0x2c1   :  { %v553_v52 = vsel %vm138_vm1, %v535_v46, 0.0 }
 0x2c2   :  { %v554_v56 = vadd.f32 %v553_v52, %v552_v54 }
 0x2c6   :  { %v537_v38 = vpop.f32.mrf.mxu2 }
 0x2c7   :  { %v538_v50 = vadd.f32 %v798_v20, %v537_v38 }
 0x2c9   :  { %v555_v55 = vsel %vm138_vm1, %v538_v50, 0.0 }
 0x2ca   :  { %v556_v58 = vadd.f32 %v555_v55, %v554_v56  ;;  %v799_v55 = vld [vmem:[%s1201_s11] ss:$0 sm:$0xff] }
 0x2ce   :  { %v540_v48 = vpop.f32.mrf.mxu2 }
 0x2cf   :  { %v541_v53 = vadd.f32 %v798_v20, %v540_v48 }
 0x2d1   :  { %v557_v57 = vsel %vm138_vm1, %v541_v53, 0.0 }
 0x2d2   :  { %v558_v3 = vadd.f32 %v557_v57, %v556_v58 }
 0x2d6   :  { %v543_v60 = vpop.f32.mrf.mxu2 }
 0x2d7   :  { %v544_v61 = vadd.f32 %v798_v20, %v543_v60 }
 0x2d9   :  { %v559_v4 = vsel %vm138_vm1, %v544_v61, 0.0 }
 0x2da   :  { %v560_v5 = vadd.f32 %v559_v4, %v558_v3 }
 0x2dc   :  { %v561_v7 = vrot.slane %v560_v5, 4 }
 0x2de   :  { %v562_v62 = vadd.f32 %v561_v7, %v560_v5 }
 0x2e0   :  { %v563_v8 = vrot.slane %v562_v62, 2 }
 0x2e2   :  { %v564_v2 = vadd.f32 %v563_v8, %v562_v62 }
 0x2e4   :  { %v565_v6 = vrot.slane %v564_v2, 1 }
 0x2e6   :  { %v566_v9 = vadd.f32 %v565_v6, %v564_v2 }
 0x2e8   :  { %v567_v63 = vmul.f32 %v566_v9, %v958_v59 }
 0x2ea   :  { %v568_v12 = vsub.f32 %v523_v40, %v567_v63  ;;  %v569_v13 = vsub.f32 %v526_v39, %v567_v63  ;;  %v1090_v14 = vsub.f32 %v529_v41, %v567_v63  ;;  %v1092_v15 = vsub.f32 %v532_v43, %v567_v63  ;;  %v676_v41 = vld [vmem:[%s1203_s13 + $0x18] sm:$0xff] }
 0x2eb   :  { %v1094_v10 = vsub.f32 %v535_v46, %v567_v63  ;;  %v1098_v21 = vsub.f32 %v538_v50, %v567_v63  ;;  %v1104_v25 = vsub.f32 %v541_v53, %v567_v63  ;;  %v1109_v28 = vsub.f32 %v544_v61, %v567_v63  ;;  %717 = vmatpush.msra.mxu3 %v676_v41  ;;  %v673_v46 = vld [vmem:[%s1203_s13] sm:$0xff] }
 0x2ec   :  { %v576_v17 = vmul.f32 %v568_v12, %v568_v12  ;;  %v577_v18 = vmul.f32 %v569_v13, %v569_v13  ;;  %v578_v19 = vmul.f32 %v1090_v14, %v1090_v14  ;;  %v579_v0 = vmul.f32 %v1092_v15, %v1092_v15 }
 0x2ed   :  { %v580_v1 = vmul.f32 %v1094_v10, %v1094_v10  ;;  %v581_v29 = vmul.f32 %v1098_v21, %v1098_v21  ;;  %v582_v31 = vmul.f32 %v1104_v25, %v1104_v25  ;;  %v583_v16 = vmul.f32 %v1109_v28, %v1109_v28  ;;  %718 = vmatpush.msra.mxu3 %v675_v42 }
 0x2ee   :  { %v584_v22 = vsel %vm138_vm1, %v576_v17, 0.0  ;;  %v585_v23 = vsel %vm138_vm1, %v577_v18, 0.0  ;;  %v587_v26 = vsel %vm138_vm1, %v578_v19, 0.0  ;;  %v589_v11 = vsel %vm138_vm1, %v579_v0, 0.0 }
 0x2ef   :  { %v586_v24 = vadd.f32 %v585_v23, %v584_v22  ;;  %v591_v32 = vsel %vm138_vm1, %v580_v1, 0.0  ;;  %v593_v34 = vsel %vm138_vm1, %v581_v29, 0.0  ;;  %v595_v36 = vsel %vm138_vm1, %v582_v31, 0.0  ;;  %719 = vmatpush.msra.mxu3 %v674_v44 }
 0x2f0   :  { %v597_v20 = vsel %vm138_vm1, %v583_v16, 0.0  ;;  %v621_v58 = vmul.f32 %v799_v55, %v568_v12  ;;  %v622_v3 = vmul.f32 %v799_v55, %v569_v13  ;;  %v623_v2 = vmul.f32 %v799_v55, %v1090_v14 }
 0x2f1   :  { %v588_v27 = vadd.f32 %v587_v26, %v586_v24  ;;  %720 = vmatpush.msra.mxu3 %v673_v46  ;;  %v624_v17 = vmul.f32 %v799_v55, %v1092_v15  ;;  %v625_v22 = vmul.f32 %v799_v55, %v1094_v10  ;;  %v20_v15 = vstv %s1204_s14 }
 0x2f2   :  { %v626_v26 = vmul.f32 %v799_v55, %v1098_v21  ;;  %21 = vst [vmem:[#allocation2] sm:$0x1] %v20_v15  ;;  %v627_v10 = vmul.f32 %v799_v55, %v1104_v25 }
 0x2f3   :  { %v590_v30 = vadd.f32 %v589_v11, %v588_v27 }
 0x2f5   :  { %v592_v33 = vadd.f32 %v591_v32, %v590_v30 }
 0x2f7   :  { %v594_v35 = vadd.f32 %v593_v34, %v592_v33  ;;  %v628_v34 = vmul.f32 %v799_v55, %v1109_v28 }
 0x2f9   :  { %v596_v37 = vadd.f32 %v595_v36, %v594_v35  ;;  %v801_v25 = vld [vmem:[#allocation2] ss:$0 sm:$0xff] }
 0x2fb   :  { %v598_v38 = vadd.f32 %v597_v20, %v596_v37 }
 0x2fd   :  { %v599_v39 = vrot.slane %v598_v38, 4 }
 0x2ff   :  { %v600_v40 = vadd.f32 %v599_v39, %v598_v38 }
 0x301   :  { %v601_v43 = vrot.slane %v600_v40, 2 }
 0x303   :  { %v602_v45 = vadd.f32 %v601_v43, %v600_v40 }
 0x305   :  { %v603_v47 = vrot.slane %v602_v45, 1 }
 0x307   :  { %v604_v48 = vadd.f32 %v603_v47, %v602_v45 }
 0x309   :  { %v605_v49 = vmul.f32 %v604_v48, %v958_v59  ;;  %v800_v59 = vld [vmem:[%s1202_s12] ss:$0 sm:$0xff] }
 0x30b   :  { %v606_v50 = vadd.f32 1e-05, %v605_v49 }
 0x30d   :  { %808 = vrsqrt.f32 %v606_v50  ;;  %vm613_vm11 = vweird.f32 %v606_v50 }
 0x313   :  { %v809_v51 = vpop.eup %808 }
 0x314   :  { %v608_v52 = vmul.f32 %v809_v51, %v606_v50  ;;  %vm614_vm10 = vweird.f32 %v809_v51 }
 0x315   :  { %vm615_vm12 = vmor %vm613_vm11, %vm614_vm10 }
 0x316   :  { %v609_v53 = vmul.f32 %v809_v51, %v608_v52 }
 0x318   :  { %v610_v54 = vmul.f32 0.5, %v609_v53 }
 0x31a   :  { %v611_v56 = vsub.f32 1.5, %v610_v54 }
 0x31c   :  { %v612_v57 = vmul.f32 %v809_v51, %v611_v56 }
 0x31e   :  { %v616_v60 = vsel %vm615_vm12, %v809_v51, %v612_v57 }
 0x31f   :  { %v629_v61 = vmul.f32 %v621_v58, %v616_v60  ;;  %v630_v5 = vmul.f32 %v622_v3, %v616_v60  ;;  %v631_v9 = vmul.f32 %v623_v2, %v616_v60  ;;  %v632_v18 = vmul.f32 %v624_v17, %v616_v60 }
 0x320   :  { %v633_v14 = vmul.f32 %v625_v22, %v616_v60  ;;  %v634_v29 = vmul.f32 %v626_v26, %v616_v60  ;;  %v635_v32 = vmul.f32 %v627_v10, %v616_v60  ;;  %v636_v21 = vmul.f32 %v628_v34, %v616_v60 }
 0x321   :  { %v641_v4 = vadd.f32 %v800_v59, %v629_v61  ;;  %v642_v8 = vadd.f32 %v800_v59, %v630_v5  ;;  %v643_v12 = vadd.f32 %v800_v59, %v631_v9  ;;  %v644_v0 = vadd.f32 %v800_v59, %v632_v18 }
 0x322   :  { %v645_v1 = vadd.f32 %v800_v59, %v633_v14  ;;  %v646_v30 = vadd.f32 %v800_v59, %v634_v29  ;;  %v647_v16 = vadd.f32 %v800_v59, %v635_v32  ;;  %v648_v37 = vadd.f32 %v800_v59, %v636_v21 }
 0x323   :  { %vm649_vm13 = vcmp.gt.f32.partialorder %v641_v4, 0.0  ;;  %v657_v7 = vmul.f32 0.01, %v641_v4  ;;  %v658_v6 = vmul.f32 0.01, %v642_v8  ;;  %vm650_vm14 = vcmp.gt.f32.partialorder %v642_v8, 0.0 }
 0x324   :  { %v659_v13 = vmul.f32 0.01, %v643_v12  ;;  %vm651_vm15 = vcmp.gt.f32.partialorder %v643_v12, 0.0  ;;  %v660_v23 = vmul.f32 0.01, %v644_v0  ;;  %vm652_vm0 = vcmp.gt.f32.partialorder %v644_v0, 0.0 }
 0x325   :  { %v665_v62 = vsel %vm649_vm13, %v641_v4, %v657_v7  ;;  %v666_v63 = vsel %vm650_vm14, %v642_v8, %v658_v6  ;;  %v661_v27 = vmul.f32 0.01, %v645_v1  ;;  %vm653_vm2 = vcmp.gt.f32.partialorder %v645_v1, 0.0 }
 0x326   :  { %783 = vmatmul.msk.f32.vlgmr.msra.gmra.mxu3 %vm138_vm1, %v665_v62  ;;  %v667_v19 = vsel %vm651_vm15, %v643_v12, %v659_v13  ;;  %v668_v24 = vsel %vm652_vm0, %v644_v0, %v660_v23  ;;  %v662_v31 = vmul.f32 0.01, %v646_v30  ;;  %vm654_vm3 = vcmp.gt.f32.partialorder %v646_v30, 0.0 }
 0x327   :  { %v669_v11 = vsel %vm653_vm2, %v645_v1, %v661_v27  ;;  %v663_v35 = vmul.f32 0.01, %v647_v16  ;;  %vm655_vm4 = vcmp.gt.f32.partialorder %v647_v16, 0.0  ;;  %v664_v20 = vmul.f32 0.01, %v648_v37 }
 0x328   :  { %v670_v33 = vsel %vm654_vm3, %v646_v30, %v662_v31  ;;  %vm656_vm5 = vcmp.gt.f32.partialorder %v648_v37, 0.0 }
 0x329   :  { %v671_v36 = vsel %vm655_vm4, %v647_v16, %v663_v35  ;;  %v672_v38 = vsel %vm656_vm5, %v648_v37, %v664_v20 }
 0x32e   :  { %784 = vmatmul.msk.f32.gmra.mxu3 %vm138_vm1, %v666_v63 }
 0x336   :  { %785 = vmatmul.msk.f32.gmra.mxu3 %vm138_vm1, %v667_v19 }
 0x33e   :  { %786 = vmatmul.msk.f32.gmra.mxu3 %vm138_vm1, %v668_v24 }
 0x346   :  { %787 = vmatmul.msk.f32.gmra.mxu3 %vm138_vm1, %v669_v11 }
 0x34e   :  { %788 = vmatmul.msk.f32.gmra.mxu3 %vm138_vm1, %v670_v33 }
 0x356   :  { %789 = vmatmul.msk.f32.gmra.mxu3 %vm138_vm1, %v671_v36 }
 0x35e   :  { %790 = vmatmul.msk.f32.gmra.mxu3 %vm138_vm1, %v672_v38 }
 0x3a9   :  { %v722_v39 = vpop.f32.mrf.mxu3 }
 0x3aa   :  { %v723_v40 = vadd.f32 %v801_v25, %v722_v39 }
 0x3ac   :  { %747 = vst.msk [vmem:[%s1205_s15] sm:$0xff] %vm746_vm6, %v723_v40 }
 0x3b1   :  { %v725_v28 = vpop.f32.mrf.mxu3 }
 0x3b2   :  { %v726_v41 = vadd.f32 %v801_v25, %v725_v28 }
 0x3b4   :  { %748 = vst.msk [vmem:[%s1205_s15 + $0x8] sm:$0xff] %vm746_vm6, %v726_v41 }
 0x3b9   :  { %v728_v42 = vpop.f32.mrf.mxu3 }
 0x3ba   :  { %v729_v43 = vadd.f32 %v801_v25, %v728_v42 }
 0x3bc   :  { %749 = vst.msk [vmem:[%s1205_s15 + $0x10] sm:$0xff] %vm746_vm6, %v729_v43 }
 0x3c1   :  { %v731_v44 = vpop.f32.mrf.mxu3 }
 0x3c2   :  { %v732_v45 = vadd.f32 %v801_v25, %v731_v44 }
 0x3c4   :  { %750 = vst.msk [vmem:[%s1205_s15 + $0x18] sm:$0xff] %vm746_vm6, %v732_v45 }
 0x3c9   :  { %v734_v46 = vpop.f32.mrf.mxu3 }
 0x3ca   :  { %v735_v47 = vadd.f32 %v801_v25, %v734_v46 }
 0x3cc   :  { %751 = vst.msk [vmem:[%s1205_s15 + $0x20] sm:$0xff] %vm746_vm6, %v735_v47 }
 0x3d1   :  { %v737_v48 = vpop.f32.mrf.mxu3 }
 0x3d2   :  { %v738_v49 = vadd.f32 %v801_v25, %v737_v48 }
 0x3d4   :  { %752 = vst.msk [vmem:[%s1205_s15 + $0x28] sm:$0xff] %vm746_vm6, %v738_v49 }
 0x3d9   :  { %v740_v50 = vpop.f32.mrf.mxu3 }
 0x3da   :  { %v741_v51 = vadd.f32 %v801_v25, %v740_v50 }
 0x3dc   :  { %753 = vst.msk [vmem:[%s1205_s15 + $0x30] sm:$0xff] %vm746_vm6, %v741_v51 }
 0x3e1   :  { %v743_v52 = vpop.f32.mrf.mxu3 }
 0x3e2   :  { %v744_v53 = vadd.f32 %v801_v25, %v743_v52 }
 0x3e4   :  { %754 = vst.msk [vmem:[%s1205_s15 + $0x38] sm:$0xff] %vm746_vm6, %v744_v53 }

</bundles_post_ra>
